<compile_context>
chip_gen: v7x
topology: tpu7x:2x2x1
jax: 0.10.0
libtpu: 0.0.40
codegen_flags: <defaults>
</compile_context>

<pallas_src>
import functools

import jax
import jax.numpy as jnp
from jax import lax
from jax.experimental import pallas as pl
from jax.experimental.pallas import tpu as pltpu

# TODO(synk): nn.Module.double() requests float64; TPU MXU/VPU have no f64 path,
# so the kernel computes in float32 (f32 accumulation via preferred_element_type).


def _policy_kernel(x_ref, w1_ref, b1_ref, w2_ref, b2_ref, w3_ref, b3_ref, o_ref):
    """One batch tile. x_ref is batch-major [tb, in]; compute is feature-major."""
    x = x_ref[...]                                                    # [tb, in]

    # h1 = W1 @ x.T  (NT contraction: both operands contract their last dim).
    h1 = lax.dot_general(w1_ref[...], x, (((1,), (1,)), ((), ())),
                         preferred_element_type=jnp.float32) + b1_ref[...]
    h1 = jnp.maximum(h1, 0.0)                                         # [16, tb]

    h2 = jnp.dot(w2_ref[...], h1, preferred_element_type=jnp.float32) + b2_ref[...]
    h2 = jnp.maximum(h2, 0.0)                                         # [16, tb]

    logits = jnp.dot(w3_ref[...], h2, preferred_element_type=jnp.float32) + b3_ref[...]
    # logits: [out, tb]

    # Softmax over the tiny feature axis (axis 0). Exact division so every
    # column sums to 1.0 to full f32 precision (approx reciprocal removed).
    m = jnp.max(logits, axis=0, keepdims=True)
    e = jnp.exp(logits - m)
    s = jnp.sum(e, axis=0, keepdims=True)
    o_ref[...] = (e / s).astype(o_ref.dtype)


def _pick_tile(batch, tile_batch):
    """Static (Python-int) batch-tile size and grid length."""
    if batch <= 128:
        return batch, 1                       # single full-array block (always legal)
    aligned = -(-batch // 128) * 128          # batch rounded up to the lane width
    tb = max(128, min((int(tile_batch) // 128) * 128, aligned))
    # Keep >=2 grid steps when there is enough batch to split, so that
    # dimension_semantics=("parallel",) can use both TensorCores on v7x.
    if tb >= aligned:
        tb = max(128, (-(-(aligned // 2) // 128)) * 128)
    return tb, -(-batch // tb)


@functools.partial(jax.jit, static_argnames=("tile_batch",))
def policy_nn_forward(x, params, tile_batch=8192):
    """x: [batch, in_dim] (batch-major, torch layout). Returns [batch, out_dim] f32."""
    w1, b1, w2, b2, w3, b3 = (params[k] for k in ("w1", "b1", "w2", "b2", "w3", "b3"))
    batch, in_dim = x.shape
    hidden = w1.shape[0]
    out_dim = w3.shape[0]

    tb, steps = _pick_tile(batch, tile_batch)

    xc = x.astype(jnp.float32)                       # no transpose, no pad
    w1c, w2c, w3c = (w.astype(jnp.float32) for w in (w1, w2, w3))
    b1c, b2c, b3c = (b.astype(jnp.float32)[:, None] for b in (b1, b2, b3))

    # Constant index map -> block stays resident in VMEM across all grid steps.
    resident = lambda a: pl.BlockSpec(a.shape, lambda i: (0, 0))

    # Rough per-step VMEM need: double-buffered x block (lane-padded in_dim->128),
    # double-buffered out block (sublane-padded out->8), plus the f32 working set
    # (h1/h2/logits/e). Raise the scoped-VMEM limit with headroom, but stay well
    # under v7x's 64 MiB physical VMEM.
    vmem_est = 2 * tb * 128 * 4 + 2 * 8 * tb * 4 + 6 * hidden * tb * 4
    vmem_limit = int(min(max(2 * vmem_est, 24 << 20), 56 << 20))

    cost = pl.CostEstimate(
        flops=2 * batch * (in_dim * hidden + hidden * hidden + hidden * out_dim),
        transcendentals=batch * out_dim,
        bytes_accessed=4 * (batch * (in_dim + out_dim)
                            + w1c.size + w2c.size + w3c.size
                            + b1c.size + b2c.size + b3c.size),
    )

    # Kernel writes a feature-major, lane-dense [out_dim, batch] slab.
    oT = pl.pallas_call(
        _policy_kernel,
        out_shape=jax.ShapeDtypeStruct((out_dim, batch), jnp.float32),
        grid=(steps,),
        in_specs=[
            pl.BlockSpec((tb, in_dim), lambda i: (i, 0)),   # batch-major x, read in place
            resident(w1c), resident(b1c),
            resident(w2c), resident(b2c),
            resident(w3c), resident(b3c),
        ],
        out_specs=pl.BlockSpec((out_dim, tb), lambda i: (0, i)),
        compiler_params=pltpu.CompilerParams(
            dimension_semantics=("parallel",),   # shard batch tiles across v7x's 2 TCs
            vmem_limit_bytes=vmem_limit,
        ),
        cost_estimate=cost,
    )(xc, w1c, b1c, w2c, b2c, w3c, b3c)

    # out_dim is tiny (~2): this transpose touches only ~8*batch bytes and XLA
    # typically fuses it into the consumer; the large x-side transpose+pad
    # passes from the previous version are eliminated.
    return oT.T


def init_params(key, input_shape, output_shape, hidden=16):
    """Deterministic init (uniform like torch.nn.Linear default), torch layout."""
    ks = jax.random.split(key, 6)

    def linear(kw, kb, fan_in, fan_out):
        bound = 1.0 / jnp.sqrt(jnp.float32(fan_in))
        w = jax.random.uniform(kw, (fan_out, fan_in), jnp.float32, -bound, bound)
        b = jax.random.uniform(kb, (fan_out,), jnp.float32, -bound, bound)
        return w, b

    w1, b1 = linear(ks[0], ks[1], input_shape, hidden)
    w2, b2 = linear(ks[2], ks[3], hidden, hidden)
    w3, b3 = linear(ks[4], ks[5], hidden, output_shape)
    return {"w1": w1, "b1": b1, "w2": w2, "b2": b2, "w3": w3, "b3": b3}


def reference_forward(x, params):
    h1 = jnp.maximum(x @ params["w1"].T + params["b1"], 0.0)
    h2 = jnp.maximum(h1 @ params["w2"].T + params["b2"], 0.0)
    logits = h2 @ params["w3"].T + params["b3"]
    return jax.nn.softmax(logits, axis=-1)


if __name__ == "__main__":
    key = jax.random.PRNGKey(0)
    k_param, k_x, k_x2, k_x3 = jax.random.split(key, 4)

    input_shape, output_shape = 4, 2   # CartPole-style state/action dims
    params = init_params(k_param, input_shape, output_shape)

    # Small case (batch=2): single full-array block.
    x = jax.random.normal(k_x, (2, input_shape), dtype=jnp.float32)
    out = policy_nn_forward(x, params)
    jax.block_until_ready(out)
    ref = reference_forward(x, params)
    assert out.shape == (2, output_shape)
    assert jnp.allclose(jnp.sum(out, axis=-1), 1.0, atol=1e-5)
    assert jnp.allclose(out, ref, atol=1e-5)

    # Batch not a multiple of the tile: exercises the 2-step grid (v7x megacore)
    # and the masked partial last block (no wrapper-side pad any more).
    x2 = jax.random.normal(k_x2, (300, input_shape), dtype=jnp.float32)
    out2 = policy_nn_forward(x2, params)
    jax.block_until_ready(out2)
    ref2 = reference_forward(x2, params)
    assert out2.shape == (300, output_shape)
    assert jnp.allclose(jnp.sum(out2, axis=-1), 1.0, atol=1e-5)
    assert jnp.allclose(out2, ref2, atol=1e-5)

    # Multi-step pipelined grid with a small explicit tile (5 steps, partial last).
    x3 = jax.random.normal(k_x3, (1030, input_shape), dtype=jnp.float32)
    out3 = policy_nn_forward(x3, params, tile_batch=256)
    jax.block_until_ready(out3)
    ref3 = reference_forward(x3, params)
    assert out3.shape == (1030, output_shape)
    assert jnp.allclose(out3, ref3, atol=1e-5)

    print("KERNEL_OK")
</pallas_src>

<mosaic_0001>
module attributes {stable_mosaic.version = 11 : i64} {
  func.func @_policy_kernel(%arg0: i32, %arg1: memref<2x4xf32, #tpu.memory_space<vmem>>, %arg2: memref<16x4xf32, #tpu.memory_space<vmem>>, %arg3: memref<16x1xf32, #tpu.memory_space<vmem>>, %arg4: memref<16x16xf32, #tpu.memory_space<vmem>>, %arg5: memref<16x1xf32, #tpu.memory_space<vmem>>, %arg6: memref<2x16xf32, #tpu.memory_space<vmem>>, %arg7: memref<2x1xf32, #tpu.memory_space<vmem>>, %arg8: memref<2x2xf32, #tpu.memory_space<vmem>>) attributes {dimension_semantics = [#tpu.dimension_semantics<parallel>], iteration_bounds = array<i64: 1>, scalar_prefetch = 0 : i64, scratch_operands = 0 : i64, tpu.core_type = #tpu.core_type<tc>, window_params = [{transform_indices = @transform_0, window_bounds = array<i64: 2, 4>}, {pipeline_mode = #tpu.pipeline_mode<synchronous>, transform_indices = @transform_1, window_bounds = array<i64: 16, 4>}, {pipeline_mode = #tpu.pipeline_mode<synchronous>, transform_indices = @transform_2, window_bounds = array<i64: 16, 1>}, {pipeline_mode = #tpu.pipeline_mode<synchronous>, transform_indices = @transform_3, window_bounds = array<i64: 16, 16>}, {pipeline_mode = #tpu.pipeline_mode<synchronous>, transform_indices = @transform_4, window_bounds = array<i64: 16, 1>}, {pipeline_mode = #tpu.pipeline_mode<synchronous>, transform_indices = @transform_5, window_bounds = array<i64: 2, 16>}, {pipeline_mode = #tpu.pipeline_mode<synchronous>, transform_indices = @transform_6, window_bounds = array<i64: 2, 1>}, {transform_indices = @transform_7, window_bounds = array<i64: 2, 2>}]} {
    %c0 = arith.constant 0 : index
    %c0_0 = arith.constant 0 : index
    %0 = vector.load %arg1[%c0, %c0_0] : memref<2x4xf32, #tpu.memory_space<vmem>>, vector<2x4xf32>
    %c0_1 = arith.constant 0 : index
    %c0_2 = arith.constant 0 : index
    %1 = vector.load %arg2[%c0_1, %c0_2] : memref<16x4xf32, #tpu.memory_space<vmem>>, vector<16x4xf32>
    %cst = arith.constant dense<0.000000e+00> : vector<16x2xf32>
    %2 = tpu.matmul %1, %0, %cst {dimension_numbers = #tpu.dot_dimension_numbers<[1], [1], [0], [0], [0, 0, 1, 0], [], []>} : vector<16x4xf32>, vector<2x4xf32>, vector<16x2xf32> -> vector<16x2xf32>
    %c0_3 = arith.constant 0 : index
    %c0_4 = arith.constant 0 : index
    %3 = vector.load %arg3[%c0_3, %c0_4] : memref<16x1xf32, #tpu.memory_space<vmem>>, vector<16x1xf32>
    %4 = vector.broadcast %3 : vector<16x1xf32> to vector<16x2xf32>
    %5 = arith.addf %2, %4 : vector<16x2xf32>
    %cst_5 = arith.constant 0.000000e+00 : f32
    %6 = vector.broadcast %cst_5 : f32 to vector<16x2xf32>
    %7 = arith.maximumf %5, %6 : vector<16x2xf32>
    %c0_6 = arith.constant 0 : index
    %c0_7 = arith.constant 0 : index
    %8 = vector.load %arg4[%c0_6, %c0_7] : memref<16x16xf32, #tpu.memory_space<vmem>>, vector<16x16xf32>
    %cst_8 = arith.constant dense<0.000000e+00> : vector<16x2xf32>
    %9 = tpu.matmul %8, %7, %cst_8 {dimension_numbers = #tpu.dot_dimension_numbers<[1], [0], [0], [1], [0, 0, 1, 1], [], []>} : vector<16x16xf32>, vector<16x2xf32>, vector<16x2xf32> -> vector<16x2xf32>
    %c0_9 = arith.constant 0 : index
    %c0_10 = arith.constant 0 : index
    %10 = vector.load %arg5[%c0_9, %c0_10] : memref<16x1xf32, #tpu.memory_space<vmem>>, vector<16x1xf32>
    %11 = vector.broadcast %10 : vector<16x1xf32> to vector<16x2xf32>
    %12 = arith.addf %9, %11 : vector<16x2xf32>
    %cst_11 = arith.constant 0.000000e+00 : f32
    %13 = vector.broadcast %cst_11 : f32 to vector<16x2xf32>
    %14 = arith.maximumf %12, %13 : vector<16x2xf32>
    %c0_12 = arith.constant 0 : index
    %c0_13 = arith.constant 0 : index
    %15 = vector.load %arg6[%c0_12, %c0_13] : memref<2x16xf32, #tpu.memory_space<vmem>>, vector<2x16xf32>
    %cst_14 = arith.constant dense<0.000000e+00> : vector<2x2xf32>
    %16 = tpu.matmul %15, %14, %cst_14 {dimension_numbers = #tpu.dot_dimension_numbers<[1], [0], [0], [1], [0, 0, 1, 1], [], []>} : vector<2x16xf32>, vector<16x2xf32>, vector<2x2xf32> -> vector<2x2xf32>
    %c0_15 = arith.constant 0 : index
    %c0_16 = arith.constant 0 : index
    %17 = vector.load %arg7[%c0_15, %c0_16] : memref<2x1xf32, #tpu.memory_space<vmem>>, vector<2x1xf32>
    %18 = vector.broadcast %17 : vector<2x1xf32> to vector<2x2xf32>
    %19 = arith.addf %16, %18 : vector<2x2xf32>
    %cst_17 = arith.constant dense<0xFF800000> : vector<2xf32>
    %20 = vector.multi_reduction <maximumf>, %19, %cst_17 [0] : vector<2x2xf32> to vector<2xf32>
    %21 = vector.shape_cast %20 : vector<2xf32> to vector<1x2xf32>
    %22 = vector.broadcast %21 : vector<1x2xf32> to vector<2x2xf32>
    %23 = arith.subf %19, %22 : vector<2x2xf32>
    %24 = math.exp %23 : vector<2x2xf32>
    %cst_18 = arith.constant dense<0.000000e+00> : vector<2xf32>
    %25 = vector.multi_reduction <add>, %24, %cst_18 [0] : vector<2x2xf32> to vector<2xf32>
    %26 = vector.shape_cast %25 : vector<2xf32> to vector<1x2xf32>
    %27 = vector.broadcast %26 : vector<1x2xf32> to vector<2x2xf32>
    %28 = arith.divf %24, %27 : vector<2x2xf32>
    %c0_19 = arith.constant 0 : index
    %c0_20 = arith.constant 0 : index
    %29 = vector.load %arg8[%c0_19, %c0_20] : memref<2x2xf32, #tpu.memory_space<vmem>>, vector<2x2xf32>
    tpu.vector_store %arg8[%c0_19, %c0_20], %28 {strides = array<i32>} : memref<2x2xf32, #tpu.memory_space<vmem>>, vector<2x2xf32>,
    return
  }
  func.func @transform_0(%arg0: i32) -> (i32, i32) {
    %c0_i32 = arith.constant 0 : i32
    %c0_i32_0 = arith.constant 0 : i32
    return %arg0, %c0_i32 : i32, i32
  }
  func.func @transform_1(%arg0: i32) -> (i32, i32) {
    %c0_i32 = arith.constant 0 : i32
    %c0_i32_0 = arith.constant 0 : i32
    %c0_i32_1 = arith.constant 0 : i32
    return %c0_i32, %c0_i32_0 : i32, i32
  }
  func.func @transform_2(%arg0: i32) -> (i32, i32) {
    %c0_i32 = arith.constant 0 : i32
    %c0_i32_0 = arith.constant 0 : i32
    %c0_i32_1 = arith.constant 0 : i32
    return %c0_i32, %c0_i32_0 : i32, i32
  }
  func.func @transform_3(%arg0: i32) -> (i32, i32) {
    %c0_i32 = arith.constant 0 : i32
    %c0_i32_0 = arith.constant 0 : i32
    %c0_i32_1 = arith.constant 0 : i32
    return %c0_i32, %c0_i32_0 : i32, i32
  }
  func.func @transform_4(%arg0: i32) -> (i32, i32) {
    %c0_i32 = arith.constant 0 : i32
    %c0_i32_0 = arith.constant 0 : i32
    %c0_i32_1 = arith.constant 0 : i32
    return %c0_i32, %c0_i32_0 : i32, i32
  }
  func.func @transform_5(%arg0: i32) -> (i32, i32) {
    %c0_i32 = arith.constant 0 : i32
    %c0_i32_0 = arith.constant 0 : i32
    %c0_i32_1 = arith.constant 0 : i32
    return %c0_i32, %c0_i32_0 : i32, i32
  }
  func.func @transform_6(%arg0: i32) -> (i32, i32) {
    %c0_i32 = arith.constant 0 : i32
    %c0_i32_0 = arith.constant 0 : i32
    %c0_i32_1 = arith.constant 0 : i32
    return %c0_i32, %c0_i32_0 : i32, i32
  }
  func.func @transform_7(%arg0: i32) -> (i32, i32) {
    %c0_i32 = arith.constant 0 : i32
    %c0_i32_0 = arith.constant 0 : i32
    return %c0_i32, %arg0 : i32, i32
  }
}

</mosaic_0001>

<bundles_post_ra>
// kernel: policy_nn_forward.1
= control target key start
LH: loop header
LB: loop body
LE: loop exit
PB: predicated region body
PF: predicated region fallthrough
CT: control target
= control target key end

     0   :  { %vm41_vm0 = vcmask 31744   ;;  %v383_v2 = vmov 0   ;;  %vm142_vm1 = vcmask 130048   ;;  %v384_v20 = vmov 0.0|0.0   ;;  %s473_s0 = inlined_call_operand.vmem [shape: f32[2,4], index: 0, kind: input, shape index: {}]   ;;  %s474_s1 = inlined_call_operand.vmem [shape: f32[16,4], index: 1, kind: input, shape index: {}]   ;;  %s475_s2 = inlined_call_operand.vmem [shape: f32[16,1], index: 2, kind: input, shape index: {}]   ;;  %s476_s6 = inlined_call_operand.vmem [shape: f32[2,1], index: 6, kind: input, shape index: {}]   ;;  %s477_s3 = inlined_call_operand.vmem [shape: f32[16,16], index: 3, kind: input, shape index: {}]   ;;  %s478_s4 = inlined_call_operand.vmem [shape: f32[16,1], index: 4, kind: input, shape index: {}]   ;;  %s479_s5 = inlined_call_operand.vmem [shape: f32[2,16], index: 5, kind: input, shape index: {}]   ;;  %s480_s7 = inlined_call_operand.vmem [shape: f32[2,2], index: 7, kind: output, shape index: {}]  }
   0x1   :  { %v26_v0 = vld [vmem:[%s473_s0] sm:$0x3]  ;;  %377 = vset.pattern.permute.xlu0 %v383_v2  ;;  %378 = vset.pattern.permute.xlu1 %v383_v2  ;;  %v28_v4 = vld [vmem:[%s474_s1 + $0x8] sm:$0xff]  ;;  %vm385_vm2 = vmmov 0   ;;  %v386_v21 = vmov 0.0   ;;  %vm306_vm3 = vcmask 9216  }
   0x2   :  { %v27_v1 = vld [vmem:[%s474_s1] sm:$0xff]  ;;  %347 = vmatprep.subr.msk.mxu0 %vm41_vm0, %v26_v0  ;;  %v30_v5 = vld [vmem:[%s475_s2 + $0x8] sm:$0xff] }
   0x3   :  { %349 = vmatprep.mubr.msk.f32.mxu0 %vm41_vm0, %v27_v1  ;;  %v29_v3 = vld [vmem:[%s475_s2] sm:$0xff]  ;;  %348 = vmatpush3.xpose.msk.msra.mxu0 %vm41_vm0, %v26_v0  ;;  %v131_v9 = vld [vmem:[%s478_s4 + $0x8] sm:$0xff] }
   0x4   :  { %33 = vperm.xlu0 %377, %v29_v3   ;;  %v227_v6 = vld [vmem:[%s476_s6] sm:$0x3]  ;;  %v129_v19 = vld [vmem:[%s477_s3 + $0x8] sm:$0xff]  ;;  %370 = vmatprep.subr.bf16.mxu0 %v384_v20 }
   0x5   :  { %v128_v7 = vld [vmem:[%s477_s3] sm:$0xff] }
   0x6   :  { %350 = vmatmul.mubr.msk.f32.vlgmr.msra.gmra.mrb[0].mxu0 %vm41_vm0, %v28_v4  ;;  %356 = vmatprep.mubr.msk.f32.mxu1 %vm142_vm1, %v128_v7  ;;  %v130_v8 = vld [vmem:[%s478_s4] sm:$0xff] }
   0x7   :  { %134 = vperm.xlu1 %378, %v130_v8   ;;  %363 = vmatprep.mubr.msk.f32.mxu0 %vm385_vm2, %v386_v21  ;;  %v226_v31 = vld [vmem:[%s479_s5] sm:$0x3] }
   0x8   :  { %38 = vperm.xlu0 %377, %v30_v5  }
   0xb   :  { %139 = vperm.xlu1 %378, %v131_v9  }
   0xc   :  { %230 = vperm.xlu0 %377, %v227_v6  }
  0x83   :  { %v34_v10 = vpop.permute.xlu0 %33 }
  0x86   :  { %v135_v22 = vpop.permute.xlu1 %134 }
  0x87   :  { %v39_v11 = vpop.permute.xlu0 %38 }
  0x8a   :  { %v140_v23 = vpop.permute.xlu1 %139 }
  0x8b   :  { %v231_v32 = vpop.permute.xlu0 %230 }
  0xd9   :  { %v351_v12 = vpop.f32.mrb[0].mxu0 }
  0xda   :  { %v123_v13 = vadd.f32 %v351_v12, %v39_v11  ;;  %v117_v14 = vpop.f32.mrb[1].mxu0 }
  0xdb   :  { %v118_v15 = vadd.f32 %v117_v14, %v34_v10 }
  0xdc   :  { %v127_v16 = vmax.f32 %v123_v13, 0.0 }
  0xdd   :  { %v126_v17 = vmax.f32 %v118_v15, 0.0 }
  0xdf   :  { %v366_v18 = vpack.c.bf16 %v127_v16, %v126_v17 }
  0xe1   :  { %367 = vmatprep.subr.bf16.mxu1 %v366_v18 }
  0xe2   :  { %369 = vmatpush3.bf16.msra.mxu1 %v366_v18 }
  0xe5   :  { %357 = vmatmul.mubr.msk.f32.vlgmr.msra.gmra.mrb[0].mxu1 %vm142_vm1, %v129_v19 }
 0x1b8   :  { %v358_v24 = vpop.f32.mrb[0].mxu1 }
 0x1b9   :  { %v221_v25 = vadd.f32 %v358_v24, %v140_v23  ;;  %v215_v26 = vpop.f32.mrb[1].mxu1 }
 0x1ba   :  { %v216_v27 = vadd.f32 %v215_v26, %v135_v22 }
 0x1bb   :  { %v225_v28 = vmax.f32 %v221_v25, 0.0 }
 0x1bc   :  { %v224_v29 = vmax.f32 %v216_v27, 0.0 }
 0x1be   :  { %v371_v30 = vpack.c.bf16 %v225_v28, %v224_v29 }
 0x1c0   :  { %372 = vmatpush3.bf16.msra.mxu0 %v371_v30 }
 0x1c3   :  { %364 = vmatmul.mubr.msk.f32.vlgmr.msra.gmra.mrb[2].mxu0 %vm142_vm1, %v226_v31 }
 0x296   :  { %v302_v33 = vpop.f32.mrb[2].mxu0 }
 0x297   :  { %v303_v34 = vadd.f32 %v302_v33, %v231_v32  ;;  %v365_v35 = vpop.f32.mrb[3].mxu0 }
 0x299   :  { %v307_v36 = vsel %vm306_vm3, %v303_v34, -inf }
 0x29a   :  { %v308_v37 = vrot.slane %v307_v36, 4 }
 0x29c   :  { %v309_v38 = vmax.f32 %v307_v36, %v308_v37 }
 0x29e   :  { %v310_v39 = vrot.slane %v309_v38, 2 }
 0x2a0   :  { %v311_v40 = vmax.f32 %v309_v38, %v310_v39 }
 0x2a2   :  { %v312_v41 = vrot.slane %v311_v40, 1 }
 0x2a4   :  { %v313_v42 = vmax.f32 %v311_v40, %v312_v41 }
 0x2a6   :  { %v314_v43 = vsub.f32 %v303_v34, %v313_v42 }
 0x2a8   :  { %v315_v44 = vmul.f32 1.442695, %v314_v43 }
 0x2aa   :  { %379 = vpow2.f32 %v315_v44 }
 0x2b4   :  { %v380_v45 = vpop.eup %379 }
 0x2b5   :  { %v317_v46 = vsel %vm306_vm3, %v380_v45, 0.0 }
 0x2b6   :  { %v318_v47 = vrot.slane %v317_v46, 4 }
 0x2b8   :  { %v319_v48 = vadd.f32 %v318_v47, %v317_v46 }
 0x2ba   :  { %v320_v49 = vrot.slane %v319_v48, 2 }
 0x2bc   :  { %v321_v50 = vadd.f32 %v320_v49, %v319_v48 }
 0x2be   :  { %v322_v51 = vrot.slane %v321_v50, 1 }
 0x2c0   :  { %v323_v52 = vadd.f32 %v322_v51, %v321_v50 }
 0x2c2   :  { %381 = vrcp.f32 %v323_v52 }
 0x2cc   :  { %v382_v53 = vpop.eup %381 }
 0x2cd   :  { %v325_v54 = vmul.f32 %v382_v53, %v380_v45 }
 0x2cf   :  { %326 = vst.msk [vmem:[%s480_s7] sm:$0x3] %vm306_vm3, %v325_v54 }

</bundles_post_ra>
